<compile_context>
chip_gen: v6e
topology: v6e:2x2x1
jax: 0.10.0
libtpu: 0.0.40
codegen_flags: <defaults>
</compile_context>

<pallas_src>
import math

import jax
import jax.numpy as jnp
import numpy as np
from jax.experimental import pallas as pl
from jax.experimental.pallas import tpu as pltpu

_MAX_DMA_CHUNKS = 4          # max DMAs kept in flight for large tensors
_MIN_CHUNK_BYTES = 1 << 20   # don't split copies below ~1 MiB per chunk


def _make_identity_dma_kernel(chunks):
    """Build a kernel that copies x_hbm -> o_hbm via async DMA.

    `chunks` is a static list of (start, size) slices along the leading dim.
    An empty list means a single whole-ref DMA.
    """

    def kernel(x_hbm, o_hbm, sem):
        copies = []
        if not chunks:
            cp = pltpu.make_async_copy(x_hbm, o_hbm, sem.at[0])
            cp.start()
            copies.append(cp)
        else:
            for idx, (start, size) in enumerate(chunks):
                cp = pltpu.make_async_copy(
                    x_hbm.at[pl.ds(start, size)],
                    o_hbm.at[pl.ds(start, size)],
                    sem.at[idx],
                )
                cp.start()
                copies.append(cp)
        # All chunk DMAs are in flight; now wait for completion.
        for cp in copies:
            cp.wait()

    return kernel


def identity(x: jax.Array, *, materialize: bool = True) -> jax.Array:
    """Pallas identity: y = x (same shape/dtype/values).

    materialize=False returns x untouched (truly free, matches nn.Identity
    semantics with no HBM traffic).  materialize=True produces a fresh output
    buffer via direct HBM->HBM DMA (1 read + 1 write, no VMEM staging).
    """
    if not materialize:
        return x

    total = math.prod(x.shape) if x.shape else 1
    if total == 0:
        return x  # nothing to copy

    itemsize = jnp.dtype(x.dtype).itemsize
    total_bytes = total * itemsize

    # Chunk along the leading dim only when it's worth overlapping several DMAs.
    chunks = []
    if x.ndim >= 1 and x.shape[0] >= 2 and total_bytes >= 2 * _MIN_CHUNK_BYTES:
        lead = x.shape[0]
        max_by_size = max(1, total_bytes // _MIN_CHUNK_BYTES)
        n_chunks = int(min(_MAX_DMA_CHUNKS, lead, max_by_size))
        chunk_rows = -(-lead // n_chunks)  # ceil div
        start = 0
        while start < lead:
            size = min(chunk_rows, lead - start)
            chunks.append((start, size))
            start += size

    n_sems = max(1, len(chunks))
    kernel = _make_identity_dma_kernel(chunks)

    return pl.pallas_call(
        kernel,
        out_shape=jax.ShapeDtypeStruct(x.shape, x.dtype),
        in_specs=[pl.BlockSpec(memory_space=pl.ANY)],
        out_specs=pl.BlockSpec(memory_space=pl.ANY),
        scratch_shapes=[pltpu.SemaphoreType.DMA((n_sems,))],
        cost_estimate=pl.CostEstimate(
            flops=0, transcendentals=0, bytes_accessed=2 * total_bytes),
    )(x)


if __name__ == "__main__":
    key = jax.random.PRNGKey(0)
    # Small NCHW-like input consistent with a generic feature tensor.
    x = jax.random.normal(key, (2, 4, 16, 16), dtype=jnp.float32)
    x_host = np.asarray(jax.device_get(x))

    y = identity(x)
    jax.block_until_ready(y)

    y_host = np.asarray(jax.device_get(y))
    assert y_host.shape == x_host.shape and y_host.dtype == x_host.dtype
    assert np.array_equal(y_host, x_host)

    # Also exercise the chunked (multi-DMA-in-flight) path with a larger tensor.
    x2 = jax.random.normal(jax.random.PRNGKey(1), (8, 256, 1024), dtype=jnp.float32)
    x2_host = np.asarray(jax.device_get(x2))
    y2 = identity(x2)
    jax.block_until_ready(y2)
    y2_host = np.asarray(jax.device_get(y2))
    assert y2_host.shape == x2_host.shape and y2_host.dtype == x2_host.dtype
    assert np.array_equal(y2_host, x2_host)

    print("KERNEL_OK")
</pallas_src>

<mosaic_0001>
module attributes {stable_mosaic.version = 11 : i64} {
  func.func @kernel(%arg0: memref<2x4x16x16xf32, #tpu.memory_space<any>>, %arg1: memref<2x4x16x16xf32, #tpu.memory_space<any>>, %arg2: memref<1x!tpu.dma_semaphore, #tpu.memory_space<semaphore_mem>>) attributes {dimension_semantics = [], scalar_prefetch = 0 : i64, scratch_operands = 1 : i64, tpu.core_type = #tpu.core_type<tc>} {
    %c0_i32 = arith.constant 0 : i32
    %0 = tpu.memref_slice %arg2[%c0_i32] : memref<1x!tpu.dma_semaphore, #tpu.memory_space<semaphore_mem>> -> memref<1x!tpu.dma_semaphore, #tpu.memory_space<semaphore_mem>>
    %1 = tpu.memref_squeeze %0 : memref<1x!tpu.dma_semaphore, #tpu.memory_space<semaphore_mem>> -> memref<!tpu.dma_semaphore, #tpu.memory_space<semaphore_mem>>
    tpu.enqueue_dma source(%arg0 : memref<2x4x16x16xf32, #tpu.memory_space<any>>) target(%arg1 : memref<2x4x16x16xf32, #tpu.memory_space<any>>) target_semaphore(%1 : memref<!tpu.dma_semaphore, #tpu.memory_space<semaphore_mem>>)
    %c0_i32_0 = arith.constant 0 : i32
    %2 = tpu.memref_slice %arg2[%c0_i32_0] : memref<1x!tpu.dma_semaphore, #tpu.memory_space<semaphore_mem>> -> memref<1x!tpu.dma_semaphore, #tpu.memory_space<semaphore_mem>>
    %3 = tpu.memref_squeeze %2 : memref<1x!tpu.dma_semaphore, #tpu.memory_space<semaphore_mem>> -> memref<!tpu.dma_semaphore, #tpu.memory_space<semaphore_mem>>
    tpu.wait_dma2 semaphore(%3 : memref<!tpu.dma_semaphore, #tpu.memory_space<semaphore_mem>>) src(%arg0 : memref<2x4x16x16xf32, #tpu.memory_space<any>>) dst(%arg1 : memref<2x4x16x16xf32, #tpu.memory_space<any>>)
    return
  }
}

</mosaic_0001>

<bundles_post_ra>
// kernel: tpu_custom_call.1
= control target key start
LH: loop header
LB: loop body
LE: loop exit
PB: predicated region body
PF: predicated region fallthrough
CT: control target
= control target key end

     0   :  { %s30_s6 = smov [#allocation2]   ;;  %s31_s7 = smov 131072   ;;  %s49_s0 = inlined_call_operand.hbm [shape: f32[2,4,16,16], index: 0, kind: input, shape index: {}]   ;;  %s50_s1 = inlined_call_operand.hbm [shape: f32[2,4,16,16], index: 1, kind: output, shape index: {}]  }
   0x1   :  { %s32_s8 = smov 0  }
   0x2   :  { %12 = dma.general %s49_s0, 2048, %s50_s1, %s30_s6, %s31_s7, [#allocation4], %s32_s8, 0  }
   0x3   :  { %28 = dma.done.wait [#allocation2], 2048 }
   0x4   :  { %29 = vsyncadd [#allocation2], 4294965248 }
   0x5   :  { %18 = vsyncmov [#allocation2] }
   0x8   :  { %s19_s13 = vpop.sfrf %18 }
   0x9   :  { %p24_p0 = scmp.ne.s32.totalorder %s19_s13, 0 }
   0xb   :  { %23 = shalt.err (%p24_p0)  }

</bundles_post_ra>
